<compile_context>
chip_gen: v7x
topology: tpu7x:2x2x1
jax: 0.10.0
libtpu: 0.0.40
codegen_flags: <defaults>
</compile_context>

<pallas_src>
import jax
import jax.numpy as jnp
from jax.experimental import pallas as pl
from jax.experimental.pallas import tpu as pltpu

LANE = 128


def meta_lstm_kernel(wf_ref, wi_ref, bf_ref, bi_ref,      # SMEM scalars
                     x_ref, c_ref, f_ref, i_ref, g_ref,   # VMEM tiles
                     f_out_ref, i_out_ref, c_out_ref):
    input_size = x_ref.shape[0]

    c_prev = c_ref[...]                                    # (tile_rows, 128)

    # f_next = sum_k x[k]*WF[k] + c_prev*WF[-2] + f_prev*WF[-1] + bF   (VPU FMAs)
    f_acc = (c_prev * wf_ref[input_size]
             + f_ref[...] * wf_ref[input_size + 1]
             + bf_ref[0])
    i_acc = (c_prev * wi_ref[input_size]
             + i_ref[...] * wi_ref[input_size + 1]
             + bi_ref[0])
    for k in range(input_size):                            # static unroll (small)
        xk = x_ref[k]
        f_acc = f_acc + xk * wf_ref[k]
        i_acc = i_acc + xk * wi_ref[k]

    # c_next = sigmoid(f_next) * c_prev - sigmoid(i_next) * grad
    c_next = jax.nn.sigmoid(f_acc) * c_prev - jax.nn.sigmoid(i_acc) * g_ref[...]

    f_out_ref[...] = f_acc
    i_out_ref[...] = i_acc
    c_out_ref[...] = c_next


def meta_lstm_cell(x_all, grad, WF, WI, cI, bF, bI, hx=None, *,
                   max_tile_rows=1024):
    """Forward pass of MetaLSTMCell. Returns (c_next, [f_next, i_next, c_next])."""
    B, input_size = x_all.shape
    hidden = WF.shape[1]
    assert hidden == 1, "MetaLSTMCell forward only makes sense for hidden_size == 1"
    assert WF.shape[0] == input_size + 2 and WI.shape == WF.shape

    if hx is None:
        f_prev = jnp.zeros((B, hidden), jnp.float32)
        i_prev = jnp.zeros((B, hidden), jnp.float32)
        c_prev = cI                                        # (n_learner_params, 1)
    else:
        f_prev, i_prev, c_prev = hx

    # --- lane-dense packing: batch -> (rows_pad, 128) planes --------------------
    rows = -(-B // LANE)
    tile_rows = min(rows, max_tile_rows)                   # whole array or 1024-row tiles
    rows_pad = -(-rows // tile_rows) * tile_rows
    B_pad = rows_pad * LANE

    def plane(v):                                          # (B,)/(B,1) -> (rows_pad, 128)
        v = jnp.asarray(v, jnp.float32).reshape(-1)
        return jnp.pad(v, (0, B_pad - v.shape[0])).reshape(rows_pad, LANE)

    c_p = plane(c_prev)
    g_p = plane(grad)
    f_p = plane(f_prev)
    i_p = plane(i_prev)
    xT = jnp.pad(jnp.asarray(x_all, jnp.float32).T,
                 ((0, 0), (0, B_pad - B))).reshape(input_size, rows_pad, LANE)

    wf = jnp.asarray(WF, jnp.float32).reshape(-1)          # (input_size + 2,)
    wi = jnp.asarray(WI, jnp.float32).reshape(-1)
    bf = jnp.asarray(bF, jnp.float32).reshape(-1)          # (1,)
    bi = jnp.asarray(bI, jnp.float32).reshape(-1)

    grid = (rows_pad // tile_rows,)

    smem_spec = pl.BlockSpec(memory_space=pltpu.MemorySpace.SMEM)
    x_spec = pl.BlockSpec((input_size, tile_rows, LANE), lambda i: (0, i, 0))
    v_spec = pl.BlockSpec((tile_rows, LANE), lambda i: (i, 0))

    out_shape = [jax.ShapeDtypeStruct((rows_pad, LANE), jnp.float32)] * 3

    f_n, i_n, c_n = pl.pallas_call(
        meta_lstm_kernel,
        grid=grid,
        in_specs=[smem_spec, smem_spec, smem_spec, smem_spec,
                  x_spec, v_spec, v_spec, v_spec, v_spec],
        out_specs=[v_spec, v_spec, v_spec],
        out_shape=out_shape,
        compiler_params=pltpu.CompilerParams(
            dimension_semantics=("parallel",)),
    )(wf, wi, bf, bi, xT, c_p, f_p, i_p, g_p)

    def unplane(p):                                        # (rows_pad, 128) -> (B, 1)
        return p.reshape(-1)[:B].reshape(B, 1)

    f_next, i_next, c_next = unplane(f_n), unplane(i_n), unplane(c_n)
    return c_next, [f_next, i_next, c_next]


def init_meta_lstm_params(key, input_size, hidden_size, n_learner_params):
    """Deterministic re-implementation of MetaLSTMCell._init_params()."""
    k_wf, k_wi, k_ci, k_bi, k_bf = jax.random.split(key, 5)
    WF = jax.random.uniform(k_wf, (input_size + 2, hidden_size),
                            jnp.float32, -0.01, 0.01)
    WI = jax.random.uniform(k_wi, (input_size + 2, hidden_size),
                            jnp.float32, -0.01, 0.01)
    cI = jax.random.uniform(k_ci, (n_learner_params, 1),
                            jnp.float32, -0.01, 0.01)
    bF = jax.random.uniform(k_bf, (1, hidden_size), jnp.float32, 4.0, 6.0)
    bI = jax.random.uniform(k_bi, (1, hidden_size), jnp.float32, -5.0, -4.0)
    return WF, WI, cI, bF, bI


def reference_forward(x_all, grad, WF, WI, cI, bF, bI):
    """Pure-JAX reference matching the PyTorch forward (hx=None path)."""
    B, _ = x_all.shape
    hidden = WF.shape[1]
    f_prev = jnp.zeros((B, hidden), jnp.float32)
    i_prev = jnp.zeros((B, hidden), jnp.float32)
    c_prev = cI
    f_next = jnp.concatenate([x_all, c_prev, f_prev], 1) @ WF + bF
    i_next = jnp.concatenate([x_all, c_prev, i_prev], 1) @ WI + bI
    c_next = jax.nn.sigmoid(f_next) * c_prev - jax.nn.sigmoid(i_next) * grad
    return c_next, [f_next, i_next, c_next]


if __name__ == "__main__":
    # hidden_size must be 1 (the PyTorch concat is input_size + 1 + hidden, and
    # WF is (input_size + 2, hidden)); batch == n_learner_params.
    input_size = 4
    hidden_size = 1
    n_learner_params = 1000          # intentionally NOT a multiple of 128
    B = n_learner_params

    key = jax.random.PRNGKey(0)
    k_params, k_x, k_g = jax.random.split(key, 3)

    WF, WI, cI, bF, bI = init_meta_lstm_params(
        k_params, input_size, hidden_size, n_learner_params)

    x_all = jax.random.normal(k_x, (B, input_size), jnp.float32)
    grad = jax.random.normal(k_g, (B, 1), jnp.float32)

    c_next, (f_next, i_next, c_next2) = meta_lstm_cell(
        x_all, grad, WF, WI, cI, bF, bI, hx=None)
    jax.block_until_ready((c_next, f_next, i_next, c_next2))

    # Correctness check against the pure-JAX reference.
    c_ref, (f_ref, i_ref, _) = reference_forward(x_all, grad, WF, WI, cI, bF, bI)
    assert jnp.allclose(f_next, f_ref, atol=1e-5, rtol=1e-5)
    assert jnp.allclose(i_next, i_ref, atol=1e-5, rtol=1e-5)
    assert jnp.allclose(c_next, c_ref, atol=1e-5, rtol=1e-5)

    print("KERNEL_OK")
</pallas_src>

<mosaic_0001>
module attributes {stable_mosaic.version = 11 : i64} {
  func.func @meta_lstm_kernel(%arg0: i32, %arg1: memref<6xf32, #tpu.memory_space<smem>>, %arg2: memref<6xf32, #tpu.memory_space<smem>>, %arg3: memref<1xf32, #tpu.memory_space<smem>>, %arg4: memref<1xf32, #tpu.memory_space<smem>>, %arg5: memref<4x8x128xf32, #tpu.memory_space<vmem>>, %arg6: memref<8x128xf32, #tpu.memory_space<vmem>>, %arg7: memref<8x128xf32, #tpu.memory_space<vmem>>, %arg8: memref<8x128xf32, #tpu.memory_space<vmem>>, %arg9: memref<8x128xf32, #tpu.memory_space<vmem>>, %arg10: memref<8x128xf32, #tpu.memory_space<vmem>>, %arg11: memref<8x128xf32, #tpu.memory_space<vmem>>, %arg12: memref<8x128xf32, #tpu.memory_space<vmem>>) attributes {dimension_semantics = [#tpu.dimension_semantics<parallel>], iteration_bounds = array<i64: 1>, scalar_prefetch = 0 : i64, scratch_operands = 0 : i64, tpu.core_type = #tpu.core_type<tc>, window_params = [{transform_indices = @transform_0, window_bounds = array<i64: 6>}, {transform_indices = @transform_1, window_bounds = array<i64: 6>}, {transform_indices = @transform_2, window_bounds = array<i64: 1>}, {transform_indices = @transform_3, window_bounds = array<i64: 1>}, {transform_indices = @transform_4, window_bounds = array<i64: 4, 8, 128>}, {transform_indices = @transform_5, window_bounds = array<i64: 8, 128>}, {transform_indices = @transform_6, window_bounds = array<i64: 8, 128>}, {transform_indices = @transform_7, window_bounds = array<i64: 8, 128>}, {transform_indices = @transform_8, window_bounds = array<i64: 8, 128>}, {transform_indices = @transform_9, window_bounds = array<i64: 8, 128>}, {transform_indices = @transform_10, window_bounds = array<i64: 8, 128>}, {transform_indices = @transform_11, window_bounds = array<i64: 8, 128>}]} {
    %c0 = arith.constant 0 : index
    %c0_0 = arith.constant 0 : index
    %0 = vector.load %arg6[%c0, %c0_0] : memref<8x128xf32, #tpu.memory_space<vmem>>, vector<8x128xf32>
    %c4 = arith.constant 4 : index
    %1 = memref.load %arg1[%c4] : memref<6xf32, #tpu.memory_space<smem>>
    %2 = vector.broadcast %1 : f32 to vector<8x128xf32>
    %3 = arith.mulf %0, %2 : vector<8x128xf32>
    %c0_1 = arith.constant 0 : index
    %c0_2 = arith.constant 0 : index
    %4 = vector.load %arg7[%c0_1, %c0_2] : memref<8x128xf32, #tpu.memory_space<vmem>>, vector<8x128xf32>
    %c5 = arith.constant 5 : index
    %5 = memref.load %arg1[%c5] : memref<6xf32, #tpu.memory_space<smem>>
    %6 = vector.broadcast %5 : f32 to vector<8x128xf32>
    %7 = arith.mulf %4, %6 : vector<8x128xf32>
    %8 = arith.addf %3, %7 : vector<8x128xf32>
    %c0_3 = arith.constant 0 : index
    %9 = memref.load %arg3[%c0_3] : memref<1xf32, #tpu.memory_space<smem>>
    %10 = vector.broadcast %9 : f32 to vector<8x128xf32>
    %11 = arith.addf %8, %10 : vector<8x128xf32>
    %c4_4 = arith.constant 4 : index
    %12 = memref.load %arg2[%c4_4] : memref<6xf32, #tpu.memory_space<smem>>
    %13 = vector.broadcast %12 : f32 to vector<8x128xf32>
    %14 = arith.mulf %0, %13 : vector<8x128xf32>
    %c0_5 = arith.constant 0 : index
    %c0_6 = arith.constant 0 : index
    %15 = vector.load %arg8[%c0_5, %c0_6] : memref<8x128xf32, #tpu.memory_space<vmem>>, vector<8x128xf32>
    %c5_7 = arith.constant 5 : index
    %16 = memref.load %arg2[%c5_7] : memref<6xf32, #tpu.memory_space<smem>>
    %17 = vector.broadcast %16 : f32 to vector<8x128xf32>
    %18 = arith.mulf %15, %17 : vector<8x128xf32>
    %19 = arith.addf %14, %18 : vector<8x128xf32>
    %c0_8 = arith.constant 0 : index
    %20 = memref.load %arg4[%c0_8] : memref<1xf32, #tpu.memory_space<smem>>
    %21 = vector.broadcast %20 : f32 to vector<8x128xf32>
    %22 = arith.addf %19, %21 : vector<8x128xf32>
    %c0_9 = arith.constant 0 : index
    %c0_10 = arith.constant 0 : index
    %c0_11 = arith.constant 0 : index
    %23 = vector.load %arg5[%c0_9, %c0_10, %c0_11] : memref<4x8x128xf32, #tpu.memory_space<vmem>>, vector<1x8x128xf32>
    %24 = vector.shape_cast %23 : vector<1x8x128xf32> to vector<8x128xf32>
    %c0_12 = arith.constant 0 : index
    %25 = memref.load %arg1[%c0_12] : memref<6xf32, #tpu.memory_space<smem>>
    %26 = vector.broadcast %25 : f32 to vector<8x128xf32>
    %27 = arith.mulf %24, %26 : vector<8x128xf32>
    %28 = arith.addf %11, %27 : vector<8x128xf32>
    %c0_13 = arith.constant 0 : index
    %29 = memref.load %arg2[%c0_13] : memref<6xf32, #tpu.memory_space<smem>>
    %30 = vector.broadcast %29 : f32 to vector<8x128xf32>
    %31 = arith.mulf %24, %30 : vector<8x128xf32>
    %32 = arith.addf %22, %31 : vector<8x128xf32>
    %c1 = arith.constant 1 : index
    %c0_14 = arith.constant 0 : index
    %c0_15 = arith.constant 0 : index
    %33 = vector.load %arg5[%c1, %c0_14, %c0_15] : memref<4x8x128xf32, #tpu.memory_space<vmem>>, vector<1x8x128xf32>
    %34 = vector.shape_cast %33 : vector<1x8x128xf32> to vector<8x128xf32>
    %c1_16 = arith.constant 1 : index
    %35 = memref.load %arg1[%c1_16] : memref<6xf32, #tpu.memory_space<smem>>
    %36 = vector.broadcast %35 : f32 to vector<8x128xf32>
    %37 = arith.mulf %34, %36 : vector<8x128xf32>
    %38 = arith.addf %28, %37 : vector<8x128xf32>
    %c1_17 = arith.constant 1 : index
    %39 = memref.load %arg2[%c1_17] : memref<6xf32, #tpu.memory_space<smem>>
    %40 = vector.broadcast %39 : f32 to vector<8x128xf32>
    %41 = arith.mulf %34, %40 : vector<8x128xf32>
    %42 = arith.addf %32, %41 : vector<8x128xf32>
    %c2 = arith.constant 2 : index
    %c0_18 = arith.constant 0 : index
    %c0_19 = arith.constant 0 : index
    %43 = vector.load %arg5[%c2, %c0_18, %c0_19] : memref<4x8x128xf32, #tpu.memory_space<vmem>>, vector<1x8x128xf32>
    %44 = vector.shape_cast %43 : vector<1x8x128xf32> to vector<8x128xf32>
    %c2_20 = arith.constant 2 : index
    %45 = memref.load %arg1[%c2_20] : memref<6xf32, #tpu.memory_space<smem>>
    %46 = vector.broadcast %45 : f32 to vector<8x128xf32>
    %47 = arith.mulf %44, %46 : vector<8x128xf32>
    %48 = arith.addf %38, %47 : vector<8x128xf32>
    %c2_21 = arith.constant 2 : index
    %49 = memref.load %arg2[%c2_21] : memref<6xf32, #tpu.memory_space<smem>>
    %50 = vector.broadcast %49 : f32 to vector<8x128xf32>
    %51 = arith.mulf %44, %50 : vector<8x128xf32>
    %52 = arith.addf %42, %51 : vector<8x128xf32>
    %c3 = arith.constant 3 : index
    %c0_22 = arith.constant 0 : index
    %c0_23 = arith.constant 0 : index
    %53 = vector.load %arg5[%c3, %c0_22, %c0_23] : memref<4x8x128xf32, #tpu.memory_space<vmem>>, vector<1x8x128xf32>
    %54 = vector.shape_cast %53 : vector<1x8x128xf32> to vector<8x128xf32>
    %c3_24 = arith.constant 3 : index
    %55 = memref.load %arg1[%c3_24] : memref<6xf32, #tpu.memory_space<smem>>
    %56 = vector.broadcast %55 : f32 to vector<8x128xf32>
    %57 = arith.mulf %54, %56 : vector<8x128xf32>
    %58 = arith.addf %48, %57 : vector<8x128xf32>
    %c3_25 = arith.constant 3 : index
    %59 = memref.load %arg2[%c3_25] : memref<6xf32, #tpu.memory_space<smem>>
    %60 = vector.broadcast %59 : f32 to vector<8x128xf32>
    %61 = arith.mulf %54, %60 : vector<8x128xf32>
    %62 = arith.addf %52, %61 : vector<8x128xf32>
    %63 = arith.negf %58 : vector<8x128xf32>
    %64 = math.exp %63 : vector<8x128xf32>
    %cst = arith.constant 1.000000e+00 : f32
    %65 = vector.broadcast %cst : f32 to vector<8x128xf32>
    %66 = arith.addf %65, %64 : vector<8x128xf32>
    %67 = arith.divf %65, %66 : vector<8x128xf32>
    %68 = arith.mulf %67, %0 : vector<8x128xf32>
    %69 = arith.negf %62 : vector<8x128xf32>
    %70 = math.exp %69 : vector<8x128xf32>
    %cst_26 = arith.constant 1.000000e+00 : f32
    %71 = vector.broadcast %cst_26 : f32 to vector<8x128xf32>
    %72 = arith.addf %71, %70 : vector<8x128xf32>
    %73 = arith.divf %71, %72 : vector<8x128xf32>
    %c0_27 = arith.constant 0 : index
    %c0_28 = arith.constant 0 : index
    %74 = vector.load %arg9[%c0_27, %c0_28] : memref<8x128xf32, #tpu.memory_space<vmem>>, vector<8x128xf32>
    %75 = arith.mulf %73, %74 : vector<8x128xf32>
    %76 = arith.subf %68, %75 : vector<8x128xf32>
    %c0_29 = arith.constant 0 : index
    %c0_30 = arith.constant 0 : index
    %77 = vector.load %arg10[%c0_29, %c0_30] : memref<8x128xf32, #tpu.memory_space<vmem>>, vector<8x128xf32>
    tpu.vector_store %arg10[%c0_29, %c0_30], %58 {strides = array<i32>} : memref<8x128xf32, #tpu.memory_space<vmem>>, vector<8x128xf32>,
    %c0_31 = arith.constant 0 : index
    %c0_32 = arith.constant 0 : index
    %78 = vector.load %arg11[%c0_31, %c0_32] : memref<8x128xf32, #tpu.memory_space<vmem>>, vector<8x128xf32>
    tpu.vector_store %arg11[%c0_31, %c0_32], %62 {strides = array<i32>} : memref<8x128xf32, #tpu.memory_space<vmem>>, vector<8x128xf32>,
    %c0_33 = arith.constant 0 : index
    %c0_34 = arith.constant 0 : index
    %79 = vector.load %arg12[%c0_33, %c0_34] : memref<8x128xf32, #tpu.memory_space<vmem>>, vector<8x128xf32>
    tpu.vector_store %arg12[%c0_33, %c0_34], %76 {strides = array<i32>} : memref<8x128xf32, #tpu.memory_space<vmem>>, vector<8x128xf32>,
    return
  }
  func.func @transform_0(%arg0: i32) -> i32 {
    %c0_i32 = arith.constant 0 : i32
    %c0_i32_0 = arith.constant 0 : i32
    return %c0_i32 : i32
  }
  func.func @transform_1(%arg0: i32) -> i32 {
    %c0_i32 = arith.constant 0 : i32
    %c0_i32_0 = arith.constant 0 : i32
    return %c0_i32 : i32
  }
  func.func @transform_2(%arg0: i32) -> i32 {
    %c0_i32 = arith.constant 0 : i32
    %c0_i32_0 = arith.constant 0 : i32
    return %c0_i32 : i32
  }
  func.func @transform_3(%arg0: i32) -> i32 {
    %c0_i32 = arith.constant 0 : i32
    %c0_i32_0 = arith.constant 0 : i32
    return %c0_i32 : i32
  }
  func.func @transform_4(%arg0: i32) -> (i32, i32, i32) {
    %c0_i32 = arith.constant 0 : i32
    %c0_i32_0 = arith.constant 0 : i32
    %c0_i32_1 = arith.constant 0 : i32
    return %c0_i32, %arg0, %c0_i32_0 : i32, i32, i32
  }
  func.func @transform_5(%arg0: i32) -> (i32, i32) {
    %c0_i32 = arith.constant 0 : i32
    %c0_i32_0 = arith.constant 0 : i32
    return %arg0, %c0_i32 : i32, i32
  }
  func.func @transform_6(%arg0: i32) -> (i32, i32) {
    %c0_i32 = arith.constant 0 : i32
    %c0_i32_0 = arith.constant 0 : i32
    return %arg0, %c0_i32 : i32, i32
  }
  func.func @transform_7(%arg0: i32) -> (i32, i32) {
    %c0_i32 = arith.constant 0 : i32
    %c0_i32_0 = arith.constant 0 : i32
    return %arg0, %c0_i32 : i32, i32
  }
  func.func @transform_8(%arg0: i32) -> (i32, i32) {
    %c0_i32 = arith.constant 0 : i32
    %c0_i32_0 = arith.constant 0 : i32
    return %arg0, %c0_i32 : i32, i32
  }
  func.func @transform_9(%arg0: i32) -> (i32, i32) {
    %c0_i32 = arith.constant 0 : i32
    %c0_i32_0 = arith.constant 0 : i32
    return %arg0, %c0_i32 : i32, i32
  }
  func.func @transform_10(%arg0: i32) -> (i32, i32) {
    %c0_i32 = arith.constant 0 : i32
    %c0_i32_0 = arith.constant 0 : i32
    return %arg0, %c0_i32 : i32, i32
  }
  func.func @transform_11(%arg0: i32) -> (i32, i32) {
    %c0_i32 = arith.constant 0 : i32
    %c0_i32_0 = arith.constant 0 : i32
    return %arg0, %c0_i32 : i32, i32
  }
}

</mosaic_0001>

<bundles_post_ra>
// kernel: tpu_custom_call.1
= control target key start
LH: loop header
LB: loop body
LE: loop exit
PB: predicated region body
PF: predicated region fallthrough
CT: control target
= control target key end

     0   :  { %19 = vsyncpa [#allocation7], 0  ;;  %s564_s0 = inlined_call_operand.vmem [shape: f32[6], index: 0, kind: input, shape index: {}]   ;;  %s565_s1 = inlined_call_operand.vmem [shape: f32[6], index: 1, kind: input, shape index: {}]   ;;  %s566_s2 = inlined_call_operand.<no memory space> [shape: f32[1], index: 2, kind: input, shape index: {}]   ;;  %s567_s3 = inlined_call_operand.<no memory space> [shape: f32[1], index: 3, kind: input, shape index: {}]   ;;  %s568_s4 = inlined_call_operand.hbm [shape: f32[4,8,128], index: 4, kind: input, shape index: {}]   ;;  %s569_s5 = inlined_call_operand.vmem [shape: f32[8,128], index: 5, kind: input, shape index: {}]   ;;  %s570_s6 = inlined_call_operand.vmem [shape: f32[8,128], index: 6, kind: input, shape index: {}]   ;;  %s571_s7 = inlined_call_operand.vmem [shape: f32[8,128], index: 7, kind: input, shape index: {}]   ;;  %s572_s8 = inlined_call_operand.hbm [shape: f32[8,128], index: 8, kind: input, shape index: {}]   ;;  %s573_s9 = inlined_call_operand.hbm [shape: f32[8,128], index: 9, kind: output, shape index: {0}]   ;;  %s574_s10 = inlined_call_operand.hbm [shape: f32[8,128], index: 10, kind: output, shape index: {1}]   ;;  %s575_s11 = inlined_call_operand.hbm [shape: f32[8,128], index: 11, kind: output, shape index: {2}]  }
   0x1   :  { %20 = vsyncpa [#allocation9], 0 }
   0x2   :  { %21 = vsyncpa [#allocation5], 0 }
   0x3   :  { %22 = vsyncpa [#allocation12], 0 }
   0x4   :  { %23 = vsyncpa [#allocation6], 0 }
   0x5   :  { %24 = vsyncpa [#allocation15], 0  ;;  %s31_s19 = sshll.u32 %s564_s0, 4  ;;  %s41_s22 = sshll.u32 %s565_s1, 4  ;;  %s32_s19 = int_to_ptr.vmem [resolvable:$true] %s31_s19  ;;  %s42_s22 = int_to_ptr.vmem [resolvable:$true] %s41_s22 }
   0x6   :  { %s245_s23 = scalar_lea.vmem %s32_s19, 16  ;;  %p250_p1 = scmp.lt.s32.totalorder %s32_s19, %s32_s19 }
   0x7   :  { %p246_p0 = scmp.ne.s32.totalorder %s32_s19, %s245_s23  ;;  %p251_p2 = scmp.lt.s32.totalorder %s245_s23, %s245_s23 }
   0x9   :  { %p252_p3 = por %p251_p2, %p250_p1 }
   0xb   :  { %p253_p4 = pnand %p252_p3, %p246_p0 }
   0xd   :  { %256 = shalt.err (!%p253_p4)
}
   0xe   :  { %s391_s24 = smov [#allocation4]   ;;  %s257_s25 = scalar_lea.vmem %s42_s22, 16 }
   0xf   :  { %34 = dma.vmem_to_smem %s32_s19, 16, %s391_s24, [#allocation7]  }
  0x10   :  { %p258_p5 = scmp.ne.s32.totalorder %s42_s22, %s257_s25  ;;  %p262_p6 = scmp.lt.s32.totalorder %s42_s22, %s42_s22 }
  0x11   :  { %p263_p7 = scmp.lt.s32.totalorder %s257_s25, %s257_s25 }
  0x13   :  { %p264_p8 = por %p263_p7, %p262_p6 }
  0x15   :  { %p265_p9 = pnand %p264_p8, %p258_p5 }
  0x17   :  { %268 = shalt.err (!%p265_p9)
}
  0x18   :  { %s392_s0 = smov [#allocation8]   ;;  %s393_s1 = smov [#allocation10]  }
  0x19   :  { %44 = dma.vmem_to_smem %s42_s22, 16, %s392_s0, [#allocation9]  }
  0x1a   :  { %s54_s26 = sshll.u32 %s393_s1, 4  ;;  %s269_s29 = scalar_lea.hbm %s568_s4, 512  ;;  %s55_s26 = int_to_ptr.vmem [resolvable:$true] %s54_s26 }
  0x1b   :  { %p270_p10 = scmp.ne.s32.totalorder %s568_s4, %s269_s29  ;;  %p273_p11 = scmp.lt.u32.totalorder %s269_s29, %s568_s4 }
  0x1d   :  { %p275_p12 = pnand %p273_p11, %p270_p10 }
  0x1f   :  { %278 = shalt.err (!%p275_p12)
}
  0x20   :  { %s279_s15 = scalar_lea.vmem %s55_s26, 512  ;;  %p284_p0 = scmp.lt.s32.totalorder %s55_s26, %s55_s26 }
  0x21   :  { %p280_p13 = scmp.ne.s32.totalorder %s55_s26, %s279_s15  ;;  %p285_p1 = scmp.lt.s32.totalorder %s279_s15, %s279_s15 }
  0x23   :  { %p286_p2 = por %p285_p1, %p284_p0 }
  0x25   :  { %p287_p3 = pnand %p286_p2, %p280_p13 }
  0x27   :  { %290 = shalt.err (!%p287_p3)
}
  0x28   :  { %s394_s16 = smov 128   ;;  %s395_s17 = smov 8  }
  0x29   :  { %60 = dma.hbm_to_vmem [thread:$0]  %s568_s4, 512, %s55_s26, [#allocation5], %s394_s16, %s394_s16, %s395_s17  }
  0x2a   :  { %s396_s20 = smov [#allocation11]   ;;  %s291_s24 = scalar_lea.hbm %s572_s8, 128 }
  0x2b   :  { %s73_s21 = sshll.u32 %s396_s20, 4  ;;  %p292_p4 = scmp.ne.s32.totalorder %s572_s8, %s291_s24  ;;  %s74_s21 = int_to_ptr.vmem [resolvable:$true] %s73_s21 }
  0x2c   :  { %p295_p5 = scmp.lt.u32.totalorder %s291_s24, %s572_s8 }
  0x2e   :  { %p297_p6 = pnand %p295_p5, %p292_p4 }
  0x30   :  { %300 = shalt.err (!%p297_p6)
}
  0x31   :  { %s301_s28 = scalar_lea.vmem %s74_s21, 128  ;;  %p306_p8 = scmp.lt.s32.totalorder %s74_s21, %s74_s21 }
  0x32   :  { %p302_p7 = scmp.ne.s32.totalorder %s74_s21, %s301_s28  ;;  %p307_p9 = scmp.lt.s32.totalorder %s301_s28, %s301_s28 }
  0x34   :  { %p308_p10 = por %p307_p9, %p306_p8 }
  0x36   :  { %p309_p11 = pnand %p308_p10, %p302_p7 }
  0x38   :  { %312 = shalt.err (!%p309_p11)
}
  0x39   :  { %76 = dma.hbm_to_vmem [thread:$0]  %s572_s8, 128, %s74_s21, [#allocation12]  }
  0x3a   :  { %379 = dma.done.wait [#allocation7], 16  }
  0x3b   :  { %380 = vsyncadd [#allocation7], 4294967280 }
  0x3c   :  { %381 = dma.done.wait [#allocation9], 16  }
  0x3d   :  { %382 = vsyncadd [#allocation9], 4294967280 }
  0x3e   :  { %383 = dma.done.wait [#allocation5], 512  }
  0x3f   :  { %384 = vsyncadd [#allocation5], 4294966784 }
  0x40   :  { %385 = dma.done.wait [#allocation12], 128  }
  0x41   :  { %386 = vsyncadd [#allocation12], 4294967168 }
  0x42   :  { %89 = sfence }
  0x43   :  { %s218_s29 = sld [smem:[#allocation8 + $0x4]]  ;;  %s219_s30 = sld [smem:[#allocation8 + $0x5]]  ;;  %v497_v0 = vld [vmem:[%s569_s5] sm:$0xff]  ;;  %v111_v8 = vstv %s567_s3  ;;  %v123_v9 = vld [vmem:[#allocation10 + $0x8] sm:$0xff]  ;;  %v133_v15 = vld [vmem:[#allocation10 + $0x10] sm:$0xff]  ;;  %v100_v25 = vstv %s566_s2 }
  0x44   :  { %s118_s12 = sld [smem:[#allocation8]]  ;;  %s221_s13 = sld [smem:[#allocation8 + $0x1]]  ;;  %v105_v1 = vld [vmem:[%s571_s7] sm:$0xff]  ;;  %v143_v23 = vld [vmem:[#allocation10 + $0x18] sm:$0xff] }
  0x45   :  { %s490_s14 = sld [smem:[#allocation8 + $0x2]]  ;;  %s492_s15 = sld [smem:[#allocation8 + $0x3]]  ;;  %v113_v4 = vld [vmem:[#allocation10] sm:$0xff] }
  0x46   :  { %s216_s16 = sld [smem:[#allocation4 + $0x4]]  ;;  %s217_s17 = sld [smem:[#allocation4 + $0x5]]  ;;  %v94_v11 = vld [vmem:[%s570_s6] sm:$0xff] }
  0x47   :  { %s502_s21 = sld [smem:[#allocation4]]  ;;  %s504_s22 = sld [smem:[#allocation4 + $0x1]] }
  0x48   :  { %s506_s23 = sld [smem:[#allocation4 + $0x2]]  ;;  %s515_s0 = sld [smem:[#allocation4 + $0x3]] }
  0x49   :  { %v103_v2 = vstv %s218_s29  ;;  %v107_v3 = vstv %s219_s30  ;;  %s397_s1 = smov [#allocation14]   ;;  %s398_s2 = smov [#allocation13]  }
  0x4a   :  { %v104_v5 = vmul.f32 %v103_v2, %v497_v0  ;;  %v108_v6 = vmul.f32 %v107_v3, %v105_v1  ;;  %v119_v7 = vstv %s118_s12  ;;  %v129_v10 = vstv %s221_s13  ;;  %s187_s27 = sshll.u32 %s397_s1, 4  ;;  %s177_s28 = sshll.u32 %s398_s2, 4  ;;  %s188_s27 = int_to_ptr.vmem [resolvable:$true] %s187_s27  ;;  %s178_s28 = int_to_ptr.vmem [resolvable:$true] %s177_s28 }
  0x4b   :  { %v120_v13 = vmul.f32 %v119_v7, %v113_v4  ;;  %v139_v16 = vstv %s490_s14  ;;  %v130_v21 = vmul.f32 %v129_v10, %v123_v9  ;;  %v149_v24 = vstv %s492_s15  ;;  %s313_s4 = scalar_lea.vmem %s188_s27, 128  ;;  %p318_p13 = scmp.lt.s32.totalorder %s188_s27, %s188_s27 }
  0x4c   :  { %v109_v12 = vadd.f32 %v108_v6, %v104_v5  ;;  %v92_v14 = vstv %s216_s16  ;;  %v96_v18 = vstv %s217_s17  ;;  %v140_v28 = vmul.f32 %v139_v16, %v133_v15  ;;  %p314_p12 = scmp.ne.s32.totalorder %s188_s27, %s313_s4  ;;  %p319_p0 = scmp.lt.s32.totalorder %s313_s4, %s313_s4 }
  0x4d   :  { %v93_v17 = vmul.f32 %v92_v14, %v497_v0  ;;  %v115_v19 = vstv %s502_s21  ;;  %v97_v22 = vmul.f32 %v96_v18, %v94_v11  ;;  %v125_v26 = vstv %s504_s22 }
  0x4e   :  { %v112_v20 = vadd.f32 %v111_v8, %v109_v12  ;;  %v116_v30 = vmul.f32 %v115_v19, %v113_v4  ;;  %v135_v31 = vstv %s506_s23  ;;  %v150_v33 = vmul.f32 %v149_v24, %v143_v23  ;;  %p320_p1 = por %p319_p0, %p318_p13 }
  0x4f   :  { %v98_v29 = vadd.f32 %v97_v22, %v93_v17  ;;  %v126_v35 = vmul.f32 %v125_v26, %v123_v9  ;;  %v145_v36 = vstv %s515_s0  ;;  %v136_v39 = vmul.f32 %v135_v31, %v133_v15 }
  0x50   :  { %v121_v27 = vadd.f32 %v120_v13, %v112_v20  ;;  %v146_v42 = vmul.f32 %v145_v36, %v143_v23  ;;  %p321_p2 = pnand %p320_p1, %p314_p12 }
  0x51   :  { %v101_v34 = vadd.f32 %v100_v25, %v98_v29 }
  0x52   :  { %v131_v32 = vadd.f32 %v130_v21, %v121_v27 }
  0x53   :  { %v117_v38 = vadd.f32 %v116_v30, %v101_v34 }
  0x54   :  { %v141_v37 = vadd.f32 %v140_v28, %v131_v32 }
  0x55   :  { %v127_v41 = vadd.f32 %v126_v35, %v117_v38 }
  0x56   :  { %v151_v40 = vadd.f32 %v150_v33, %v141_v37 }
  0x57   :  { %v137_v44 = vadd.f32 %v136_v39, %v127_v41 }
  0x58   :  { %v227_v43 = vmul.f32 -1.442695, %v151_v40  ;;  %169 = vst [vmem:[#allocation14] sm:$0xff] %v151_v40 }
  0x59   :  { %324 = shalt.err (!%p321_p2)
}
  0x5a   :  { %s325_s30 = scalar_lea.hbm %s574_s10, 128 }
  0x5b   :  { %p326_p3 = scmp.ne.s32.totalorder %s574_s10, %s325_s30  ;;  %p329_p4 = scmp.lt.u32.totalorder %s325_s30, %s574_s10 }
  0x5d   :  { %p331_p5 = pnand %p329_p4, %p326_p3 }
  0x5f   :  { %334 = shalt.err (!%p331_p5)
}
  0x60   :  { %190 = dma.vmem_to_hbm [thread:$0]  %s188_s27, 128, %s574_s10, [#allocation15]   ;;  %237 = vpow2.f32 %v227_v43  ;;  %v147_v45 = vadd.f32 %v146_v42, %v137_v44 }
  0x61   :  { %s335_s8 = scalar_lea.vmem %s178_s28, 128  ;;  %p340_p7 = scmp.lt.s32.totalorder %s178_s28, %s178_s28 }
  0x62   :  { %v226_v46 = vmul.f32 -1.442695, %v147_v45  ;;  %168 = vst [vmem:[#allocation13] sm:$0xff] %v147_v45  ;;  %p336_p6 = scmp.ne.s32.totalorder %s178_s28, %s335_s8  ;;  %p341_p8 = scmp.lt.s32.totalorder %s335_s8, %s335_s8 }
  0x64   :  { %p342_p9 = por %p341_p8, %p340_p7 }
  0x66   :  { %p343_p10 = pnand %p342_p9, %p336_p6 }
  0x68   :  { %346 = shalt.err (!%p343_p10)
}
  0x69   :  { %s347_s20 = scalar_lea.hbm %s573_s9, 128 }
  0x6a   :  { %p348_p11 = scmp.ne.s32.totalorder %s573_s9, %s347_s20  ;;  %p351_p12 = scmp.lt.u32.totalorder %s347_s20, %s573_s9 }
  0x6c   :  { %p353_p13 = pnand %p351_p12, %p348_p11 }
  0x6e   :  { %356 = shalt.err (!%p353_p13)
}
  0x6f   :  { %180 = dma.vmem_to_hbm [thread:$0]  %s178_s28, 128, %s573_s9, [#allocation6]   ;;  %239 = vpow2.f32 %v226_v46  ;;  %v238_v47 = vpop.eup %237  ;;  %v165_v52 = vld [vmem:[#allocation11] sm:$0xff] }
  0x70   :  { %v162_v48 = vadd.f32 1.0, %v238_v47  ;;  %s399_s7 = smov [#allocation16]  }
  0x71   :  { %s197_s25 = sshll.u32 %s399_s7, 4  ;;  %s198_s25 = int_to_ptr.vmem [resolvable:$true] %s197_s25 }
  0x72   :  { %241 = vrcp.f32 %v162_v48  ;;  %s357_s0 = scalar_lea.vmem %s198_s25, 128  ;;  %p362_p1 = scmp.lt.s32.totalorder %s198_s25, %s198_s25 }
  0x73   :  { %p358_p0 = scmp.ne.s32.totalorder %s198_s25, %s357_s0  ;;  %p363_p2 = scmp.lt.s32.totalorder %s357_s0, %s357_s0 }
  0x75   :  { %p364_p3 = por %p363_p2, %p362_p1 }
  0x77   :  { %p365_p4 = pnand %p364_p3, %p358_p0 }
  0x79   :  { %v240_v49 = vpop.eup %239 }
  0x7a   :  { %v155_v50 = vadd.f32 1.0, %v240_v49 }
  0x7c   :  { %243 = vrcp.f32 %v155_v50  ;;  %v242_v51 = vpop.eup %241 }
  0x7d   :  { %v166_v53 = vmul.f32 %v242_v51, %v165_v52 }
  0x86   :  { %v244_v54 = vpop.eup %243 }
  0x87   :  { %v158_v55 = vmul.f32 %v244_v54, %v497_v0 }
  0x89   :  { %v167_v56 = vsub.f32 %v158_v55, %v166_v53 }
  0x8b   :  { %170 = vst [vmem:[#allocation16] sm:$0xff] %v167_v56 }
  0x8c   :  { %368 = shalt.err (!%p365_p4)
}
  0x8d   :  { %s369_s6 = scalar_lea.hbm %s575_s11, 128 }
  0x8e   :  { %p370_p5 = scmp.ne.s32.totalorder %s575_s11, %s369_s6  ;;  %p373_p6 = scmp.lt.u32.totalorder %s369_s6, %s575_s11 }
  0x90   :  { %p375_p7 = pnand %p373_p6, %p370_p5 }
  0x92   :  { %378 = shalt.err (!%p375_p7)
}
  0x93   :  { %200 = dma.vmem_to_hbm [thread:$0]  %s198_s25, 128, %s575_s11, [#allocation15]  }
  0x94   :  { %387 = dma.done.wait [#allocation6], 128  }
  0x95   :  { %388 = vsyncadd [#allocation6], 4294967168 }
  0x96   :  { %389 = dma.done.wait [#allocation15], 256  }
  0x97   :  { %390 = vsyncadd [#allocation15], 4294967040 }
  0x98   :  { %210 = vsyncpa [#allocation5], 1 }
  0x99   :  { %211 = vsyncpa [#allocation12], 1 }
  0x9a   :  { %212 = vsyncpa [#allocation6], 1 }
  0x9b   :  { %213 = vsyncpa [#allocation15], 1 }
  0x9c   :  { %214 = vsyncpa [#allocation7], 1 }
  0x9d   :  { %215 = vsyncpa [#allocation9], 1 }

</bundles_post_ra>
